<compile_context>
chip_gen: v5e
topology: v5e:2x2
jax: 0.10.0
libtpu: 0.0.40
codegen_flags: <defaults>
</compile_context>

<pallas_src>
import functools

import jax
import jax.numpy as jnp
from jax.experimental import pallas as pl
from jax.experimental.pallas import tpu as pltpu


def _batchnorm1d_kernel(x_ref, w_ref, b_ref, o_ref, *, eps, inv_n, f, tile_f, mask_last):
    # x_ref: (N, TILE_F) — whole batch axis resident, dim-0 reduction is local.
    xf = x_ref[...].astype(jnp.float32)                       # (N, TILE_F)
    w = w_ref[...].astype(jnp.float32)                        # (1, TILE_F)
    b = b_ref[...].astype(jnp.float32)                        # (1, TILE_F)

    if mask_last:
        # Ragged last feature tile: zero the out-of-range lanes so stats stay clean
        # and no NaN/Inf is produced in lanes that the masked store will drop anyway.
        lane = jax.lax.broadcasted_iota(jnp.int32, (1, xf.shape[1]), 1)
        valid = (pl.program_id(0) * tile_f + lane) < f        # (1, TILE_F)
        xf = jnp.where(valid, xf, 0.0)
        w = jnp.where(valid, w, 0.0)
        b = jnp.where(valid, b, 0.0)

    # Two-pass statistics over the batch (sublane) axis — matches the reference's
    # mean((x - mean)^2) numerics (no E[x^2]-mean^2 cancellation).
    mean = jnp.sum(xf, axis=0, keepdims=True) * inv_n         # (1, TILE_F)
    diff = xf - mean
    var = jnp.sum(diff * diff, axis=0, keepdims=True) * inv_n # biased / population
    std = jnp.sqrt(var)

    # Per-feature scale/shift (eps added to std, matching the reference math),
    # then a single fused multiply-add per element.
    inv = pl.reciprocal(std + eps, approx=False)              # (1, TILE_F)
    scale = w * inv
    shift = b - mean * scale
    o_ref[...] = (xf * scale + shift).astype(o_ref.dtype)


def _pick_tile_f(n, f, itemsize, vmem_budget):
    """Largest lane tile (multiple of 128, <= round_up(F,128)) whose footprint of
    double-buffered input + output tiles plus the (N, TILE_F) f32 intermediates
    stays within the generation-aware VMEM budget."""
    # per lane-column: 2x input buf, 2x output buf, ~2 f32 temps (xf / diff).
    bytes_per_col = n * (2 * itemsize + 2 * itemsize + 8) + 64
    f_ceil = ((f + 127) // 128) * 128
    for cand in (4096, 2048, 1024, 512, 256, 128):
        if cand <= f_ceil and cand * bytes_per_col <= vmem_budget:
            return cand
    # TODO(synk): N-tiled two-pass stats path for batches too large for VMEM.
    raise NotImplementedError(
        "batch dimension too large for single-pass VMEM-resident stats "
        f"(N={n}, budget={vmem_budget} bytes)")


def batchnorm1d(x, weight, bias, eps=1e-5):
    """Custom BatchNorm1d forward (training-mode math) as a Pallas TPU kernel.

    x:      (N, F)
    weight: (F,)
    bias:   (F,)
    returns (N, F), same dtype as x.
    """
    n, f = x.shape
    itemsize = jnp.dtype(x.dtype).itemsize
    w2 = weight.reshape(1, f)
    b2 = bias.reshape(1, f)

    # Generation-aware VMEM sizing: ~128 MiB on v5e/v6e, 64 MiB per TC on v7x.
    try:
        vmem_cap = int(pltpu.get_tpu_info().vmem_capacity_bytes)
    except Exception:
        vmem_cap = 64 * 1024 * 1024
    vmem_limit = (vmem_cap * 5) // 8          # ~80 MiB on v5e/v6e, ~40 MiB on v7x
    tile_budget = (vmem_limit * 3) // 4       # headroom for params / compiler scratch

    tile_f = _pick_tile_f(n, f, itemsize, tile_budget)
    # Keep >= 4 grid steps when possible: feeds both v7x TensorCores via the
    # "parallel" axis and keeps the DMA double-buffer busy.
    while tile_f > 128 and pl.cdiv(f, tile_f) < 4:
        tile_f //= 2
    f_tiles = pl.cdiv(f, tile_f)
    mask_last = (f % tile_f) != 0

    kernel = functools.partial(
        _batchnorm1d_kernel, eps=eps, inv_n=1.0 / n,
        f=f, tile_f=tile_f, mask_last=mask_last)

    # Deeper pipelining only pays when per-tile DMAs are small and the grid is long.
    deep = (tile_f <= 256) and (f_tiles >= 3)
    pipe_kw = {"pipeline_mode": pl.Buffered(3)} if deep else {}
    x_spec = pl.BlockSpec((n, tile_f), lambda j: (0, j), **pipe_kw)
    o_spec = pl.BlockSpec((n, tile_f), lambda j: (0, j), **pipe_kw)

    cost = pl.CostEstimate(
        flops=8 * n * f,
        transcendentals=2 * f,                 # sqrt + reciprocal per feature
        bytes_accessed=2 * n * f * itemsize + 3 * f * 4,
    )

    return pl.pallas_call(
        kernel,
        out_shape=jax.ShapeDtypeStruct((n, f), x.dtype),
        grid=(f_tiles,),
        in_specs=[
            x_spec,
            pl.BlockSpec((1, tile_f), lambda j: (0, j)),
            pl.BlockSpec((1, tile_f), lambda j: (0, j)),
        ],
        out_specs=o_spec,
        compiler_params=pltpu.CompilerParams(
            dimension_semantics=("parallel",),   # shard F tiles across v7x's 2 TCs
            vmem_limit_bytes=vmem_limit,
        ),
        cost_estimate=cost,
    )(x, w2, b2)


if __name__ == "__main__":
    key = jax.random.PRNGKey(0)
    N, F = 8, 32  # batch=8, num_features=32

    x = jax.random.normal(key, (N, F), dtype=jnp.float32)
    # Deterministic parameter init matching nn.Parameter(torch.ones/zeros(F)).
    weight = jnp.ones((F,), dtype=jnp.float32)
    bias = jnp.zeros((F,), dtype=jnp.float32)

    out = batchnorm1d(x, weight, bias, eps=1e-5)
    out = jax.block_until_ready(out)

    # Pure-JAX reference of the same math (eps added to std, biased variance).
    mean = jnp.mean(x, axis=0, keepdims=True)
    std = jnp.sqrt(jnp.mean((x - mean) ** 2, axis=0, keepdims=True))
    ref = weight * ((x - mean) / (std + 1e-5)) + bias
    assert out.shape == (N, F)
    assert jnp.max(jnp.abs(out - ref)) < 1e-5

    print("KERNEL_OK")
</pallas_src>

<mosaic_0001>
module attributes {stable_mosaic.version = 11 : i64} {
  func.func @_batchnorm1d_kernel(%arg0: i32, %arg1: memref<8x128xf32, #tpu.memory_space<vmem>>, %arg2: memref<1x128xf32, #tpu.memory_space<vmem>>, %arg3: memref<1x128xf32, #tpu.memory_space<vmem>>, %arg4: memref<8x128xf32, #tpu.memory_space<vmem>>) attributes {dimension_semantics = [#tpu.dimension_semantics<parallel>], iteration_bounds = array<i64: 1>, scalar_prefetch = 0 : i64, scratch_operands = 0 : i64, tpu.core_type = #tpu.core_type<tc>, window_params = [{transform_indices = @transform_0, window_bounds = array<i64: 8, 128>}, {transform_indices = @transform_1, window_bounds = array<i64: 1, 128>}, {transform_indices = @transform_2, window_bounds = array<i64: 1, 128>}, {transform_indices = @transform_3, window_bounds = array<i64: 8, 128>}]} {
    %c0 = arith.constant 0 : index
    %c0_0 = arith.constant 0 : index
    %0 = vector.load %arg1[%c0, %c0_0] : memref<8x128xf32, #tpu.memory_space<vmem>>, vector<8x128xf32>
    %c0_1 = arith.constant 0 : index
    %c0_2 = arith.constant 0 : index
    %1 = vector.load %arg2[%c0_1, %c0_2] : memref<1x128xf32, #tpu.memory_space<vmem>>, vector<1x128xf32>
    %c0_3 = arith.constant 0 : index
    %c0_4 = arith.constant 0 : index
    %2 = vector.load %arg3[%c0_3, %c0_4] : memref<1x128xf32, #tpu.memory_space<vmem>>, vector<1x128xf32>
    %3 = tpu.iota {dimensions = array<i32: 1>} : vector<1x128xi32>
    %c128_i32 = arith.constant 128 : i32
    %4 = arith.muli %arg0, %c128_i32 : i32
    %5 = vector.broadcast %4 : i32 to vector<1x128xi32>
    %6 = arith.addi %5, %3 : vector<1x128xi32>
    %c32_i32 = arith.constant 32 : i32
    %7 = vector.broadcast %c32_i32 : i32 to vector<1x128xi32>
    %8 = arith.cmpi slt, %6, %7 : vector<1x128xi32>
    %cst = arith.constant 0.000000e+00 : f32
    %9 = vector.shape_cast %8 : vector<1x128xi1> to vector<1x128xi1>
    %10 = vector.broadcast %9 : vector<1x128xi1> to vector<8x128xi1>
    %11 = vector.broadcast %cst : f32 to vector<8x128xf32>
    %12 = arith.select %10, %0, %11 : vector<8x128xi1>, vector<8x128xf32>
    %cst_5 = arith.constant 0.000000e+00 : f32
    %13 = vector.broadcast %cst_5 : f32 to vector<1x128xf32>
    %14 = arith.select %8, %1, %13 : vector<1x128xi1>, vector<1x128xf32>
    %cst_6 = arith.constant 0.000000e+00 : f32
    %15 = vector.broadcast %cst_6 : f32 to vector<1x128xf32>
    %16 = arith.select %8, %2, %15 : vector<1x128xi1>, vector<1x128xf32>
    %cst_7 = arith.constant dense<0.000000e+00> : vector<128xf32>
    %17 = vector.multi_reduction <add>, %12, %cst_7 [0] : vector<8x128xf32> to vector<128xf32>
    %18 = vector.shape_cast %17 : vector<128xf32> to vector<1x128xf32>
    %cst_8 = arith.constant 1.250000e-01 : f32
    %19 = vector.broadcast %cst_8 : f32 to vector<1x128xf32>
    %20 = arith.mulf %18, %19 : vector<1x128xf32>
    %21 = vector.broadcast %20 : vector<1x128xf32> to vector<8x128xf32>
    %22 = arith.subf %12, %21 : vector<8x128xf32>
    %23 = arith.mulf %22, %22 : vector<8x128xf32>
    %cst_9 = arith.constant dense<0.000000e+00> : vector<128xf32>
    %24 = vector.multi_reduction <add>, %23, %cst_9 [0] : vector<8x128xf32> to vector<128xf32>
    %25 = vector.shape_cast %24 : vector<128xf32> to vector<1x128xf32>
    %cst_10 = arith.constant 1.250000e-01 : f32
    %26 = vector.broadcast %cst_10 : f32 to vector<1x128xf32>
    %27 = arith.mulf %25, %26 : vector<1x128xf32>
    %28 = math.sqrt %27 : vector<1x128xf32>
    %cst_11 = arith.constant 9.99999974E-6 : f32
    %29 = vector.broadcast %cst_11 : f32 to vector<1x128xf32>
    %30 = arith.addf %28, %29 : vector<1x128xf32>
    %31 = tpu.reciprocal %30 : vector<1x128xf32> -> vector<1x128xf32>
    %32 = arith.mulf %14, %31 : vector<1x128xf32>
    %33 = arith.mulf %20, %32 : vector<1x128xf32>
    %34 = arith.subf %16, %33 : vector<1x128xf32>
    %35 = vector.broadcast %32 : vector<1x128xf32> to vector<8x128xf32>
    %36 = arith.mulf %12, %35 : vector<8x128xf32>
    %37 = vector.broadcast %34 : vector<1x128xf32> to vector<8x128xf32>
    %38 = arith.addf %36, %37 : vector<8x128xf32>
    %c0_12 = arith.constant 0 : index
    %c0_13 = arith.constant 0 : index
    %39 = vector.load %arg4[%c0_12, %c0_13] : memref<8x128xf32, #tpu.memory_space<vmem>>, vector<8x128xf32>
    tpu.vector_store %arg4[%c0_12, %c0_13], %38 {strides = array<i32>} : memref<8x128xf32, #tpu.memory_space<vmem>>, vector<8x128xf32>,
    return
  }
  func.func @transform_0(%arg0: i32) -> (i32, i32) {
    %c0_i32 = arith.constant 0 : i32
    %c0_i32_0 = arith.constant 0 : i32
    return %c0_i32, %arg0 : i32, i32
  }
  func.func @transform_1(%arg0: i32) -> (i32, i32) {
    %c0_i32 = arith.constant 0 : i32
    %c0_i32_0 = arith.constant 0 : i32
    return %c0_i32, %arg0 : i32, i32
  }
  func.func @transform_2(%arg0: i32) -> (i32, i32) {
    %c0_i32 = arith.constant 0 : i32
    %c0_i32_0 = arith.constant 0 : i32
    return %c0_i32, %arg0 : i32, i32
  }
  func.func @transform_3(%arg0: i32) -> (i32, i32) {
    %c0_i32 = arith.constant 0 : i32
    %c0_i32_0 = arith.constant 0 : i32
    return %c0_i32, %arg0 : i32, i32
  }
}

</mosaic_0001>

<bundles_post_ra>
// kernel: tpu_custom_call.1
= control target key start
LH: loop header
LB: loop body
LE: loop exit
PB: predicated region body
PF: predicated region fallthrough
CT: control target
= control target key end

     0   :  { %8 = vsyncpa [#allocation3], 0  ;;  %s249_s0 = inlined_call_operand.hbm [shape: f32[8,32], index: 0, kind: input, shape index: {}]   ;;  %s250_s1 = inlined_call_operand.hbm [shape: f32[1,32], index: 1, kind: input, shape index: {}]   ;;  %s251_s2 = inlined_call_operand.vmem [shape: f32[1,32], index: 2, kind: input, shape index: {}]   ;;  %s252_s3 = inlined_call_operand.hbm [shape: f32[8,32], index: 3, kind: output, shape index: {}]  }
   0x1   :  { %9 = vsyncpa [#allocation6], 0 }
   0x2   :  { %10 = vsyncpa [#allocation4], 0  ;;  %s16_s14 = sshll.u32 %s249_s0, 4  ;;  %s211_s15 = smov [#allocation2]   ;;  %s17_s14 = int_to_ptr.hbm [resolvable:$true] %s16_s14 }
   0x3   :  { %s18_s16 = sshll.u32 %s211_s15, 4  ;;  %s27_s19 = sshll.u32 %s250_s1, 4  ;;  %s19_s16 = int_to_ptr.vmem [resolvable:$true] %s18_s16  ;;  %s28_s19 = int_to_ptr.hbm [resolvable:$true] %s27_s19 }
   0x4   :  { %21 = dma.hbm_to_vmem [thread:$0]  %s17_s14, 128, %s19_s16, [#allocation3]  }
   0x5   :  { %s212_s20 = smov [#allocation5]  }
   0x6   :  { %s29_s21 = sshll.u32 %s212_s20, 4  ;;  %s30_s21 = int_to_ptr.vmem [resolvable:$true] %s29_s21 }
   0x7   :  { %32 = dma.hbm_to_vmem [thread:$0]  %s28_s19, 16, %s30_s21, [#allocation6]  }
   0x8   :  { %205 = dma.done.wait [#allocation3], 128  }
   0x9   :  { %206 = vsyncadd [#allocation3], 4294967168 }
   0xa   :  { %207 = dma.done.wait [#allocation6], 16  }
   0xb   :  { %208 = vsyncadd [#allocation6], 4294967280  ;;  %v46_v0 = vlaneseq  ;;  %v43_v2 = vld [vmem:[#allocation2] sm:$0xff]  ;;  %v44_v36 = vld [vmem:[#allocation5] sm:$0x1]  ;;  %s213_s22 = smov [#allocation7]  }
   0xc   :  { %v45_v41 = vld [vmem:[%s251_s2] sm:$0x1]  ;;  %s113_s23 = sshll.u32 %s213_s22, 4  ;;  %s115_s26 = sshll.u32 %s252_s3, 4  ;;  %s114_s23 = int_to_ptr.vmem [resolvable:$true] %s113_s23  ;;  %s116_s26 = int_to_ptr.hbm [resolvable:$true] %s115_s26 }
   0xd   :  { %v47_v1 = vand.u32 127, %v46_v0 }
   0xf   :  { %vm51_vm0 = vcmp.lt.s32.totalorder %v47_v1, 32 }
  0x10   :  { %v54_v3 = vsel %vm51_vm0, %v43_v2, 0.0  ;;  %v55_v40 = vsel %vm51_vm0, %v44_v36, 0.0  ;;  %v56_v45 = vsel %vm51_vm0, %v45_v41, 0.0 }
  0x11   :  { %v57_v4 = vrot.slane %v54_v3, 4 }
  0x13   :  { %v58_v5 = vadd.f32 %v57_v4, %v54_v3 }
  0x15   :  { %v59_v6 = vrot.slane %v58_v5, 2 }
  0x17   :  { %v60_v7 = vadd.f32 %v59_v6, %v58_v5 }
  0x19   :  { %v61_v8 = vrot.slane %v60_v7, 1 }
  0x1b   :  { %v62_v9 = vadd.f32 %v61_v8, %v60_v7 }
  0x1d   :  { %v63_v10 = vmul.f32 0.125, %v62_v9 }
  0x1f   :  { %v64_v11 = vsub.f32 %v54_v3, %v63_v10 }
  0x21   :  { %v65_v12 = vmul.f32 %v64_v11, %v64_v11 }
  0x23   :  { %v66_v13 = vrot.slane %v65_v12, 4 }
  0x25   :  { %v67_v14 = vadd.f32 %v66_v13, %v65_v12 }
  0x27   :  { %v68_v15 = vrot.slane %v67_v14, 2 }
  0x29   :  { %v69_v16 = vadd.f32 %v68_v15, %v67_v14 }
  0x2b   :  { %v70_v17 = vrot.slane %v69_v16, 1 }
  0x2d   :  { %v71_v18 = vadd.f32 %v70_v17, %v69_v16 }
  0x2f   :  { %v72_v19 = vmul.f32 0.125, %v71_v18 }
  0x31   :  { %129 = vrsqrt.f32 %v72_v19  ;;  %vm80_vm1 = vcmp.eq.f32.partialorder %v72_v19, inf  ;;  %v83_v26 = vand.u32 2147483648, %v72_v19  ;;  %vm82_vm2 = vcmp.eq.f32.partialorder %v72_v19, 0.0 }
  0x37   :  { %v130_v20 = vpop.eup %129 }
  0x38   :  { %v74_v21 = vmul.f32 %v130_v20, %v72_v19 }
  0x3a   :  { %v75_v22 = vmul.f32 %v130_v20, %v74_v21 }
  0x3c   :  { %v76_v23 = vmul.f32 0.5, %v75_v22 }
  0x3e   :  { %v77_v24 = vsub.f32 1.5, %v76_v23 }
  0x40   :  { %v78_v25 = vmul.f32 %v130_v20, %v77_v24 }
  0x42   :  { %v79_v27 = vmul.f32 %v78_v25, %v72_v19 }
  0x44   :  { %v81_v28 = vsel %vm80_vm1, %v72_v19, %v79_v27 }
  0x45   :  { %v84_v29 = vsel %vm82_vm2, %v83_v26, %v81_v28 }
  0x46   :  { %v85_v30 = vadd.f32 1e-05, %v84_v29 }
  0x48   :  { %131 = vrcp.f32 %v85_v30  ;;  %v97_v33 = vand.u32 2147483648, %v85_v30  ;;  %vm91_vm3 = vweird.f32 %v85_v30  ;;  %v95_v35 = vand.u32 2147483647, %v85_v30 }
  0x4a   :  { %v98_v38 = vor.u32 1.1754944e-38, %v97_v33  ;;  %vm96_vm6 = vcmp.eq.f32.partialorder %v95_v35, 8.507059e+37 }
  0x4e   :  { %v132_v31 = vpop.eup %131 }
  0x4f   :  { %v87_v32 = vmul.f32 %v132_v31, %v85_v30  ;;  %vm92_vm4 = vweird.f32 %v132_v31 }
  0x50   :  { %vm93_vm5 = vmor %vm91_vm3, %vm92_vm4 }
  0x51   :  { %v88_v34 = vsub.f32 1.0, %v87_v32 }
  0x53   :  { %v89_v37 = vmul.f32 %v132_v31, %v88_v34 }
  0x55   :  { %v90_v39 = vadd.f32 %v132_v31, %v89_v37 }
  0x57   :  { %v94_v42 = vsel %vm93_vm5, %v132_v31, %v90_v39 }
  0x58   :  { %v99_v43 = vsel %vm96_vm6, %v98_v38, %v94_v42 }
  0x59   :  { %v100_v44 = vmul.f32 %v99_v43, %v55_v40 }
  0x5b   :  { %v101_v46 = vmul.f32 %v100_v44, %v63_v10  ;;  %v103_v47 = vperm.slane %v100_v44, 0 }
  0x5d   :  { %v102_v48 = vsub.f32 %v56_v45, %v101_v46  ;;  %v104_v49 = vmul.f32 %v103_v47, %v54_v3 }
  0x5f   :  { %v105_v50 = vperm.slane %v102_v48, 0 }
  0x61   :  { %v106_v51 = vadd.f32 %v105_v50, %v104_v49 }
  0x63   :  { %107 = vst [vmem:[#allocation7] sm:$0xff] %v106_v51 }
  0x64   :  { %118 = dma.vmem_to_hbm [thread:$0]  %s114_s23, 128, %s116_s26, [#allocation4]  }
  0x65   :  { %209 = dma.done.wait [#allocation4], 128  }
  0x66   :  { %210 = vsyncadd [#allocation4], 4294967168 }
  0x67   :  { %123 = vsyncpa [#allocation3], 1 }
  0x68   :  { %124 = vsyncpa [#allocation6], 1 }
  0x69   :  { %125 = vsyncpa [#allocation4], 1 }

</bundles_post_ra>
